<compile_context>
chip_gen: v5e
topology: v5e:2x2
jax: 0.10.0
libtpu: 0.0.40
codegen_flags: <defaults>
</compile_context>

<pallas_src>
import math
import functools

import jax
import jax.numpy as jnp
from jax.experimental import pallas as pl
from jax.experimental.pallas import tpu as pltpu


# -----------------------------------------------------------------------------
# Kernel 1: fused QKV projection + head-major regroup.
#   grid = (batch, seq_tiles); each step projects one (ts, D) row tile.
# -----------------------------------------------------------------------------
def qkv_proj_kernel(x_ref, wqkv_ref, bqkv_ref, q_ref, k_ref, v_ref, *, n_heads):
    x = x_ref[0]                                        # (ts, D) f32
    ts, D = x.shape
    dph = D // n_heads

    # One fused bf16 MXU GEMM with f32 accumulation; the 1/sqrt(dph) scale is
    # already folded into the Q columns of wqkv/bqkv (prepare_mha_params).
    qkv = jnp.dot(x.astype(jnp.bfloat16), wqkv_ref[...],
                  preferred_element_type=jnp.float32) + bqkv_ref[...]   # (ts, 3D)

    # Cast ONCE to bf16 before any head-split copies (halves the copy traffic).
    qkv16 = qkv.astype(jnp.bfloat16)

    # Head-major regroup, writing directly into the (1, H, ts, dph) output
    # blocks (no jnp.stack, no scratch).  Static slices only, so the Mosaic
    # lowering path is the same well-supported one as a plain slice+store.
    for h in range(n_heads):
        lo = h * dph
        q_ref[0, h] = qkv16[:, 0 * D + lo: 0 * D + lo + dph]
        k_ref[0, h] = qkv16[:, 1 * D + lo: 1 * D + lo + dph]
        v_ref[0, h] = qkv16[:, 2 * D + lo: 2 * D + lo + dph]


# -----------------------------------------------------------------------------
# Kernel 2: attention + accumulated output projection.
#   grid = (batch, q_tiles, heads); head axis is the reduction axis.
# -----------------------------------------------------------------------------
def attn_kernel(q_ref, k_ref, v_ref, bias_ref, wo_ref, bo_ref, o_ref, acc_ref):
    h = pl.program_id(2)

    @pl.when(h == 0)
    def _():
        acc_ref[...] = jnp.zeros_like(acc_ref)

    q = q_ref[0, 0]                                     # (tq, dph) bf16
    k = k_ref[0, 0]                                     # (S,  dph) bf16
    v = v_ref[0, 0]                                     # (S,  dph) bf16
    bias = bias_ref[0]                                  # (1, S) f32 additive key mask

    # Per-head scores + masked softmax (f32 math; v5e-safe).
    s = jnp.einsum("qd,kd->qk", q, k,
                   preferred_element_type=jnp.float32) + bias          # (tq, S)
    m = jnp.max(s, axis=-1, keepdims=True)
    p = jnp.exp(s - m)                                                  # (tq, S)
    l = jnp.sum(p, axis=-1, keepdims=True)                              # (tq, 1)

    # Unnormalized context; defer the 1/l normalization to the small
    # (tq, dph) tensor (EUP reciprocal, ~S/dph fewer VALU multiplies than
    # normalizing the (tq, S) probabilities).
    ctx = jnp.dot(p.astype(jnp.bfloat16), v,
                  preferred_element_type=jnp.float32)                   # (tq, dph)
    ctx = ctx * pl.reciprocal(l, approx=True)

    # Output projection accumulated per head: out = sum_h ctx_h @ Wo_h.
    # Every store is lane-dense (D wide); no ctx-regroup scratch / masked vst.
    acc_ref[...] += jnp.dot(ctx.astype(jnp.bfloat16), wo_ref[...],
                            preferred_element_type=jnp.float32)         # (tq, D)

    @pl.when(h == pl.num_programs(2) - 1)
    def _():
        o_ref[0] = (acc_ref[...] + bo_ref[...]).astype(o_ref.dtype)


# -----------------------------------------------------------------------------
# Wrapper
# -----------------------------------------------------------------------------
def prepare_mha_params(params, n_heads):
    """One-time weight fusion -- call at parameter-load time, NOT per forward."""
    wq, bq, wk, bk, wv, bv, wo, bo = params
    D = wq.shape[0]
    dph = D // n_heads
    scale = 1.0 / math.sqrt(dph)
    # Fused QKV weight in (in, out) layout, q-scale folded in, bf16 for the MXU.
    wqkv = jnp.concatenate([wq.T * scale, wk.T, wv.T], axis=1).astype(jnp.bfloat16)
    bqkv = jnp.concatenate([bq * scale, bk, bv]).reshape(1, 3 * D).astype(jnp.float32)
    # Output projection in (in, out) layout; rows are grouped by head (h*dph + d),
    # so rows [h*dph:(h+1)*dph] are exactly head h's slice for the accumulation.
    wo_t = wo.T.astype(jnp.bfloat16)                                   # (D, D)
    bo2 = bo.reshape(1, D).astype(jnp.float32)
    return wqkv, bqkv, wo_t, bo2


def _vmem_limit_bytes():
    try:
        cap = int(pltpu.get_tpu_info().vmem_capacity_bytes)
    except Exception:
        cap = 64 << 20          # assume the smallest generation (v7x: 64 MiB / TC)
    # Leave headroom below physical VMEM for compiler scratch + double buffers
    # (v7x -> 48 MiB, v5e/v6e -> 64 MiB).  Never request more than physical.
    return max(min(cap - (16 << 20), 64 << 20), 32 << 20)


def _pick_tile(extent, preferred):
    return preferred if extent % preferred == 0 else extent


def mha_self_attention(x, mask, prepared_params, n_heads, *,
                       seq_tile=256, q_tile=128):
    """DistilBERT MultiHeadSelfAttention forward (eval mode, self-attention).

    x:    (bs, S, D) float32 -- used as query, key and value.
    mask: (bs, S), 1 = attend, 0 = masked (matches the (bs,1,1,S) broadcast).
    prepared_params: output of prepare_mha_params().
    """
    # TODO(synk): training-mode attention dropout, output_attentions (returning
    # the (bs,H,S,S) weights), head_mask and cross-attention with distinct
    # key/value tensors are not implemented -- eval-mode self-attention only.
    bs, S, D = x.shape
    assert D % n_heads == 0
    dph = D // n_heads
    wqkv, bqkv, wo_t, bo2 = prepared_params

    ts = _pick_tile(S, seq_tile)    # QKV projection row tile
    tq = _pick_tile(S, q_tile)      # attention query tile

    # Additive key mask: 0 where attended, -1e30 where masked.
    # (PyTorch uses -inf; -1e30 keeps fully-masked rows finite instead of NaN.)
    attn_bias = jnp.where(mask.reshape(bs, 1, S) == 0, -1e30, 0.0).astype(jnp.float32)

    vmem_limit = _vmem_limit_bytes()
    f32b, bf16b = 4, 2

    # ---------------- kernel 1: fused QKV projection --------------------------
    qkv_cost = pl.CostEstimate(
        flops=int(2 * bs * S * D * 3 * D),
        transcendentals=0,
        bytes_accessed=int(bs * S * D * f32b + 3 * D * D * bf16b
                           + 3 * bs * S * D * bf16b),
    )
    head_shape = jax.ShapeDtypeStruct((bs, n_heads, S, dph), jnp.bfloat16)
    # NOTE: pipeline_mode=pl.Buffered(1) on the constant weight specs would
    # reclaim the duplicate weight buffer (~5 MiB at DistilBERT size on v7x);
    # left on the default pipeline path here, working set is well under budget.
    q_hbm, k_hbm, v_hbm = pl.pallas_call(
        functools.partial(qkv_proj_kernel, n_heads=n_heads),
        out_shape=(head_shape, head_shape, head_shape),
        grid_spec=pltpu.PrefetchScalarGridSpec(
            num_scalar_prefetch=0,
            grid=(bs, S // ts),
            in_specs=[
                pl.BlockSpec((1, ts, D), lambda b, s: (b, s, 0)),       # x (q==k==v)
                pl.BlockSpec((D, 3 * D), lambda b, s: (0, 0)),          # Wqkv^T bf16
                pl.BlockSpec((1, 3 * D), lambda b, s: (0, 0)),          # fused bias f32
            ],
            out_specs=[
                pl.BlockSpec((1, n_heads, ts, dph), lambda b, s: (b, 0, s, 0)),
                pl.BlockSpec((1, n_heads, ts, dph), lambda b, s: (b, 0, s, 0)),
                pl.BlockSpec((1, n_heads, ts, dph), lambda b, s: (b, 0, s, 0)),
            ],
        ),
        compiler_params=pltpu.CompilerParams(
            dimension_semantics=("parallel", "parallel"),
            vmem_limit_bytes=vmem_limit,
        ),
        cost_estimate=qkv_cost,
    )(x, wqkv, bqkv)

    # --------- kernel 2: attention + output projection (head = reduction) -----
    attn_cost = pl.CostEstimate(
        flops=int(2 * bs * (2 * S * S * D + S * D * D)),
        transcendentals=int(bs * n_heads * S * (S + 1)),
        bytes_accessed=int(3 * bs * S * D * bf16b + bs * S * f32b
                           + D * D * bf16b + bs * S * D * f32b),
    )
    out = pl.pallas_call(
        attn_kernel,
        # Output kept f32 to match the PyTorch module; emit bf16 here if the
        # downstream consumer accepts it (halves output writeback).
        out_shape=jax.ShapeDtypeStruct((bs, S, D), jnp.float32),
        grid_spec=pltpu.PrefetchScalarGridSpec(
            num_scalar_prefetch=0,
            grid=(bs, S // tq, n_heads),        # reduction (head) axis last
            in_specs=[
                pl.BlockSpec((1, 1, tq, dph), lambda b, qi, h: (b, h, qi, 0)),  # q tile
                pl.BlockSpec((1, 1, S, dph), lambda b, qi, h: (b, h, 0, 0)),    # k (full S)
                pl.BlockSpec((1, 1, S, dph), lambda b, qi, h: (b, h, 0, 0)),    # v (full S)
                pl.BlockSpec((1, 1, S), lambda b, qi, h: (b, 0, 0)),            # key-mask bias
                pl.BlockSpec((dph, D), lambda b, qi, h: (h, 0)),                # Wo_h rows
                pl.BlockSpec((1, D), lambda b, qi, h: (0, 0)),                  # bo
            ],
            out_specs=pl.BlockSpec((1, tq, D), lambda b, qi, h: (b, qi, 0)),
            scratch_shapes=[pltpu.VMEM((tq, D), jnp.float32)],                  # out accumulator
        ),
        compiler_params=pltpu.CompilerParams(
            dimension_semantics=("parallel", "parallel", "arbitrary"),
            vmem_limit_bytes=vmem_limit,
        ),
        cost_estimate=attn_cost,
    )(q_hbm, k_hbm, v_hbm, attn_bias, wo_t, bo2)
    return out


# -----------------------------------------------------------------------------
# Pure-JAX reference (mirrors the PyTorch forward, eval mode)
# -----------------------------------------------------------------------------
def ref_mha(query, key, value, mask, params, n_heads):
    wq, bq, wk, bk, wv, bv, wo, bo = params
    bs, S, D = query.shape
    dph = D // n_heads

    def lin(x, w, b):
        return x @ w.T + b

    def shape(x):
        return x.reshape(bs, S, n_heads, dph).transpose(0, 2, 1, 3)

    q = shape(lin(query, wq, bq)) / math.sqrt(dph)
    k = shape(lin(key, wk, bk))
    v = shape(lin(value, wv, bv))

    scores = jnp.einsum("bhqd,bhkd->bhqk", q, k)
    scores = jnp.where((mask == 0).reshape(bs, 1, 1, S), -1e30, scores)
    w = jax.nn.softmax(scores, axis=-1)
    ctx = jnp.einsum("bhqk,bhkd->bhqd", w, v).transpose(0, 2, 1, 3).reshape(bs, S, D)
    return ctx @ wo.T + bo


if __name__ == "__main__":
    bs, seq, dim, n_heads = 2, 8, 32, 4

    key0 = jax.random.PRNGKey(0)
    ks = jax.random.split(key0, 10)

    # Deterministic synthetic parameters (PyTorch nn.Linear layout: (out, in)).
    def w(k):
        return (0.02 * jax.random.normal(k, (dim, dim))).astype(jnp.float32)

    def b(k):
        return (0.02 * jax.random.normal(k, (dim,))).astype(jnp.float32)

    params = (w(ks[0]), b(ks[1]), w(ks[2]), b(ks[3]),
              w(ks[4]), b(ks[5]), w(ks[6]), b(ks[7]))

    x = jax.random.normal(ks[8], (bs, seq, dim), dtype=jnp.float32)

    # Attention mask (bs, seq): 1 = attend, 0 = masked. Mask last 2 keys of batch 1.
    mask = jnp.ones((bs, seq), dtype=jnp.float32)
    mask = mask.at[1, -2:].set(0.0)

    prepared = prepare_mha_params(params, n_heads)       # one-time, hoisted
    out = mha_self_attention(x, mask, prepared, n_heads)
    out = jax.block_until_ready(out)

    ref = ref_mha(x, x, x, mask, params, n_heads)
    assert out.shape == (bs, seq, dim)
    max_err = float(jnp.max(jnp.abs(out - ref)))
    assert jnp.allclose(out, ref, atol=2e-2, rtol=2e-2), \
        f"mismatch vs reference (max abs err {max_err})"

    print("KERNEL_OK")
</pallas_src>

<mosaic_0001>
module attributes {stable_mosaic.version = 11 : i64} {
  func.func @qkv_proj_kernel(%arg0: i32, %arg1: i32, %arg2: memref<1x8x32xf32, #tpu.memory_space<vmem>>, %arg3: memref<32x96xbf16, #tpu.memory_space<vmem>>, %arg4: memref<1x96xf32, #tpu.memory_space<vmem>>, %arg5: memref<1x4x8x8xbf16, #tpu.memory_space<vmem>>, %arg6: memref<1x4x8x8xbf16, #tpu.memory_space<vmem>>, %arg7: memref<1x4x8x8xbf16, #tpu.memory_space<vmem>>) attributes {dimension_semantics = [#tpu.dimension_semantics<parallel>, #tpu.dimension_semantics<parallel>], iteration_bounds = array<i64: 2, 1>, scalar_prefetch = 0 : i64, scratch_operands = 0 : i64, tpu.core_type = #tpu.core_type<tc>, window_params = [{transform_indices = @transform_0, window_bounds = array<i64: 1, 8, 32>}, {pipeline_mode = #tpu.pipeline_mode<synchronous>, transform_indices = @transform_1, window_bounds = array<i64: 32, 96>}, {pipeline_mode = #tpu.pipeline_mode<synchronous>, transform_indices = @transform_2, window_bounds = array<i64: 1, 96>}, {transform_indices = @transform_3, window_bounds = array<i64: 1, 4, 8, 8>}, {transform_indices = @transform_4, window_bounds = array<i64: 1, 4, 8, 8>}, {transform_indices = @transform_5, window_bounds = array<i64: 1, 4, 8, 8>}]} {
    %c0 = arith.constant 0 : index
    %c0_0 = arith.constant 0 : index
    %c0_1 = arith.constant 0 : index
    %0 = vector.load %arg2[%c0, %c0_0, %c0_1] : memref<1x8x32xf32, #tpu.memory_space<vmem>>, vector<1x8x32xf32>
    %1 = vector.shape_cast %0 : vector<1x8x32xf32> to vector<8x32xf32>
    %2 = arith.truncf %1 : vector<8x32xf32> to vector<8x32xbf16>
    %c0_2 = arith.constant 0 : index
    %c0_3 = arith.constant 0 : index
    %3 = vector.load %arg3[%c0_2, %c0_3] : memref<32x96xbf16, #tpu.memory_space<vmem>>, vector<32x96xbf16>
    %cst = arith.constant dense<0.000000e+00> : vector<8x96xf32>
    %4 = tpu.matmul %2, %3, %cst {dimension_numbers = #tpu.dot_dimension_numbers<[1], [0], [0], [1], [0, 0, 1, 1], [], []>} : vector<8x32xbf16>, vector<32x96xbf16>, vector<8x96xf32> -> vector<8x96xf32>
    %c0_4 = arith.constant 0 : index
    %c0_5 = arith.constant 0 : index
    %5 = vector.load %arg4[%c0_4, %c0_5] : memref<1x96xf32, #tpu.memory_space<vmem>>, vector<1x96xf32>
    %6 = vector.broadcast %5 : vector<1x96xf32> to vector<8x96xf32>
    %7 = arith.addf %4, %6 : vector<8x96xf32>
    %8 = arith.truncf %7 : vector<8x96xf32> to vector<8x96xbf16>
    %9 = vector.extract_strided_slice %8 {offsets = [0, 0], sizes = [8, 8], strides = [1, 1]} : vector<8x96xbf16> to vector<8x8xbf16>
    %c0_6 = arith.constant 0 : index
    %c0_7 = arith.constant 0 : index
    %c0_8 = arith.constant 0 : index
    %c0_9 = arith.constant 0 : index
    %10 = vector.load %arg5[%c0_6, %c0_7, %c0_8, %c0_9] : memref<1x4x8x8xbf16, #tpu.memory_space<vmem>>, vector<1x1x8x8xbf16>
    %11 = vector.shape_cast %10 : vector<1x1x8x8xbf16> to vector<8x8xbf16>
    %12 = vector.shape_cast %9 : vector<8x8xbf16> to vector<1x1x8x8xbf16>
    tpu.vector_store %arg5[%c0_6, %c0_7, %c0_8, %c0_9], %12 {strides = array<i32>} : memref<1x4x8x8xbf16, #tpu.memory_space<vmem>>, vector<1x1x8x8xbf16>,
    %13 = vector.extract_strided_slice %8 {offsets = [0, 32], sizes = [8, 8], strides = [1, 1]} : vector<8x96xbf16> to vector<8x8xbf16>
    %c0_10 = arith.constant 0 : index
    %c0_11 = arith.constant 0 : index
    %c0_12 = arith.constant 0 : index
    %c0_13 = arith.constant 0 : index
    %14 = vector.load %arg6[%c0_10, %c0_11, %c0_12, %c0_13] : memref<1x4x8x8xbf16, #tpu.memory_space<vmem>>, vector<1x1x8x8xbf16>
    %15 = vector.shape_cast %14 : vector<1x1x8x8xbf16> to vector<8x8xbf16>
    %16 = vector.shape_cast %13 : vector<8x8xbf16> to vector<1x1x8x8xbf16>
    tpu.vector_store %arg6[%c0_10, %c0_11, %c0_12, %c0_13], %16 {strides = array<i32>} : memref<1x4x8x8xbf16, #tpu.memory_space<vmem>>, vector<1x1x8x8xbf16>,
    %17 = vector.extract_strided_slice %8 {offsets = [0, 64], sizes = [8, 8], strides = [1, 1]} : vector<8x96xbf16> to vector<8x8xbf16>
    %c0_14 = arith.constant 0 : index
    %c0_15 = arith.constant 0 : index
    %c0_16 = arith.constant 0 : index
    %c0_17 = arith.constant 0 : index
    %18 = vector.load %arg7[%c0_14, %c0_15, %c0_16, %c0_17] : memref<1x4x8x8xbf16, #tpu.memory_space<vmem>>, vector<1x1x8x8xbf16>
    %19 = vector.shape_cast %18 : vector<1x1x8x8xbf16> to vector<8x8xbf16>
    %20 = vector.shape_cast %17 : vector<8x8xbf16> to vector<1x1x8x8xbf16>
    tpu.vector_store %arg7[%c0_14, %c0_15, %c0_16, %c0_17], %20 {strides = array<i32>} : memref<1x4x8x8xbf16, #tpu.memory_space<vmem>>, vector<1x1x8x8xbf16>,
    %21 = vector.extract_strided_slice %8 {offsets = [0, 8], sizes = [8, 8], strides = [1, 1]} : vector<8x96xbf16> to vector<8x8xbf16>
    %c0_18 = arith.constant 0 : index
    %c1 = arith.constant 1 : index
    %c0_19 = arith.constant 0 : index
    %c0_20 = arith.constant 0 : index
    %22 = vector.load %arg5[%c0_18, %c1, %c0_19, %c0_20] : memref<1x4x8x8xbf16, #tpu.memory_space<vmem>>, vector<1x1x8x8xbf16>
    %23 = vector.shape_cast %22 : vector<1x1x8x8xbf16> to vector<8x8xbf16>
    %24 = vector.shape_cast %21 : vector<8x8xbf16> to vector<1x1x8x8xbf16>
    tpu.vector_store %arg5[%c0_18, %c1, %c0_19, %c0_20], %24 {strides = array<i32>} : memref<1x4x8x8xbf16, #tpu.memory_space<vmem>>, vector<1x1x8x8xbf16>,
    %25 = vector.extract_strided_slice %8 {offsets = [0, 40], sizes = [8, 8], strides = [1, 1]} : vector<8x96xbf16> to vector<8x8xbf16>
    %c0_21 = arith.constant 0 : index
    %c1_22 = arith.constant 1 : index
    %c0_23 = arith.constant 0 : index
    %c0_24 = arith.constant 0 : index
    %26 = vector.load %arg6[%c0_21, %c1_22, %c0_23, %c0_24] : memref<1x4x8x8xbf16, #tpu.memory_space<vmem>>, vector<1x1x8x8xbf16>
    %27 = vector.shape_cast %26 : vector<1x1x8x8xbf16> to vector<8x8xbf16>
    %28 = vector.shape_cast %25 : vector<8x8xbf16> to vector<1x1x8x8xbf16>
    tpu.vector_store %arg6[%c0_21, %c1_22, %c0_23, %c0_24], %28 {strides = array<i32>} : memref<1x4x8x8xbf16, #tpu.memory_space<vmem>>, vector<1x1x8x8xbf16>,
    %29 = vector.extract_strided_slice %8 {offsets = [0, 72], sizes = [8, 8], strides = [1, 1]} : vector<8x96xbf16> to vector<8x8xbf16>
    %c0_25 = arith.constant 0 : index
    %c1_26 = arith.constant 1 : index
    %c0_27 = arith.constant 0 : index
    %c0_28 = arith.constant 0 : index
    %30 = vector.load %arg7[%c0_25, %c1_26, %c0_27, %c0_28] : memref<1x4x8x8xbf16, #tpu.memory_space<vmem>>, vector<1x1x8x8xbf16>
    %31 = vector.shape_cast %30 : vector<1x1x8x8xbf16> to vector<8x8xbf16>
    %32 = vector.shape_cast %29 : vector<8x8xbf16> to vector<1x1x8x8xbf16>
    tpu.vector_store %arg7[%c0_25, %c1_26, %c0_27, %c0_28], %32 {strides = array<i32>} : memref<1x4x8x8xbf16, #tpu.memory_space<vmem>>, vector<1x1x8x8xbf16>,
    %33 = vector.extract_strided_slice %8 {offsets = [0, 16], sizes = [8, 8], strides = [1, 1]} : vector<8x96xbf16> to vector<8x8xbf16>
    %c0_29 = arith.constant 0 : index
    %c2 = arith.constant 2 : index
    %c0_30 = arith.constant 0 : index
    %c0_31 = arith.constant 0 : index
    %34 = vector.load %arg5[%c0_29, %c2, %c0_30, %c0_31] : memref<1x4x8x8xbf16, #tpu.memory_space<vmem>>, vector<1x1x8x8xbf16>
    %35 = vector.shape_cast %34 : vector<1x1x8x8xbf16> to vector<8x8xbf16>
    %36 = vector.shape_cast %33 : vector<8x8xbf16> to vector<1x1x8x8xbf16>
    tpu.vector_store %arg5[%c0_29, %c2, %c0_30, %c0_31], %36 {strides = array<i32>} : memref<1x4x8x8xbf16, #tpu.memory_space<vmem>>, vector<1x1x8x8xbf16>,
    %37 = vector.extract_strided_slice %8 {offsets = [0, 48], sizes = [8, 8], strides = [1, 1]} : vector<8x96xbf16> to vector<8x8xbf16>
    %c0_32 = arith.constant 0 : index
    %c2_33 = arith.constant 2 : index
    %c0_34 = arith.constant 0 : index
    %c0_35 = arith.constant 0 : index
    %38 = vector.load %arg6[%c0_32, %c2_33, %c0_34, %c0_35] : memref<1x4x8x8xbf16, #tpu.memory_space<vmem>>, vector<1x1x8x8xbf16>
    %39 = vector.shape_cast %38 : vector<1x1x8x8xbf16> to vector<8x8xbf16>
    %40 = vector.shape_cast %37 : vector<8x8xbf16> to vector<1x1x8x8xbf16>
    tpu.vector_store %arg6[%c0_32, %c2_33, %c0_34, %c0_35], %40 {strides = array<i32>} : memref<1x4x8x8xbf16, #tpu.memory_space<vmem>>, vector<1x1x8x8xbf16>,
    %41 = vector.extract_strided_slice %8 {offsets = [0, 80], sizes = [8, 8], strides = [1, 1]} : vector<8x96xbf16> to vector<8x8xbf16>
    %c0_36 = arith.constant 0 : index
    %c2_37 = arith.constant 2 : index
    %c0_38 = arith.constant 0 : index
    %c0_39 = arith.constant 0 : index
    %42 = vector.load %arg7[%c0_36, %c2_37, %c0_38, %c0_39] : memref<1x4x8x8xbf16, #tpu.memory_space<vmem>>, vector<1x1x8x8xbf16>
    %43 = vector.shape_cast %42 : vector<1x1x8x8xbf16> to vector<8x8xbf16>
    %44 = vector.shape_cast %41 : vector<8x8xbf16> to vector<1x1x8x8xbf16>
    tpu.vector_store %arg7[%c0_36, %c2_37, %c0_38, %c0_39], %44 {strides = array<i32>} : memref<1x4x8x8xbf16, #tpu.memory_space<vmem>>, vector<1x1x8x8xbf16>,
    %45 = vector.extract_strided_slice %8 {offsets = [0, 24], sizes = [8, 8], strides = [1, 1]} : vector<8x96xbf16> to vector<8x8xbf16>
    %c0_40 = arith.constant 0 : index
    %c3 = arith.constant 3 : index
    %c0_41 = arith.constant 0 : index
    %c0_42 = arith.constant 0 : index
    %46 = vector.load %arg5[%c0_40, %c3, %c0_41, %c0_42] : memref<1x4x8x8xbf16, #tpu.memory_space<vmem>>, vector<1x1x8x8xbf16>
    %47 = vector.shape_cast %46 : vector<1x1x8x8xbf16> to vector<8x8xbf16>
    %48 = vector.shape_cast %45 : vector<8x8xbf16> to vector<1x1x8x8xbf16>
    tpu.vector_store %arg5[%c0_40, %c3, %c0_41, %c0_42], %48 {strides = array<i32>} : memref<1x4x8x8xbf16, #tpu.memory_space<vmem>>, vector<1x1x8x8xbf16>,
    %49 = vector.extract_strided_slice %8 {offsets = [0, 56], sizes = [8, 8], strides = [1, 1]} : vector<8x96xbf16> to vector<8x8xbf16>
    %c0_43 = arith.constant 0 : index
    %c3_44 = arith.constant 3 : index
    %c0_45 = arith.constant 0 : index
    %c0_46 = arith.constant 0 : index
    %50 = vector.load %arg6[%c0_43, %c3_44, %c0_45, %c0_46] : memref<1x4x8x8xbf16, #tpu.memory_space<vmem>>, vector<1x1x8x8xbf16>
    %51 = vector.shape_cast %50 : vector<1x1x8x8xbf16> to vector<8x8xbf16>
    %52 = vector.shape_cast %49 : vector<8x8xbf16> to vector<1x1x8x8xbf16>
    tpu.vector_store %arg6[%c0_43, %c3_44, %c0_45, %c0_46], %52 {strides = array<i32>} : memref<1x4x8x8xbf16, #tpu.memory_space<vmem>>, vector<1x1x8x8xbf16>,
    %53 = vector.extract_strided_slice %8 {offsets = [0, 88], sizes = [8, 8], strides = [1, 1]} : vector<8x96xbf16> to vector<8x8xbf16>
    %c0_47 = arith.constant 0 : index
    %c3_48 = arith.constant 3 : index
    %c0_49 = arith.constant 0 : index
    %c0_50 = arith.constant 0 : index
    %54 = vector.load %arg7[%c0_47, %c3_48, %c0_49, %c0_50] : memref<1x4x8x8xbf16, #tpu.memory_space<vmem>>, vector<1x1x8x8xbf16>
    %55 = vector.shape_cast %54 : vector<1x1x8x8xbf16> to vector<8x8xbf16>
    %56 = vector.shape_cast %53 : vector<8x8xbf16> to vector<1x1x8x8xbf16>
    tpu.vector_store %arg7[%c0_47, %c3_48, %c0_49, %c0_50], %56 {strides = array<i32>} : memref<1x4x8x8xbf16, #tpu.memory_space<vmem>>, vector<1x1x8x8xbf16>,
    return
  }
  func.func @transform_0(%arg0: i32, %arg1: i32) -> (i32, i32, i32) {
    %c0_i32 = arith.constant 0 : i32
    %c0_i32_0 = arith.constant 0 : i32
    return %arg0, %arg1, %c0_i32 : i32, i32, i32
  }
  func.func @transform_1(%arg0: i32, %arg1: i32) -> (i32, i32) {
    %c0_i32 = arith.constant 0 : i32
    %c0_i32_0 = arith.constant 0 : i32
    %c0_i32_1 = arith.constant 0 : i32
    return %c0_i32, %c0_i32_0 : i32, i32
  }
  func.func @transform_2(%arg0: i32, %arg1: i32) -> (i32, i32) {
    %c0_i32 = arith.constant 0 : i32
    %c0_i32_0 = arith.constant 0 : i32
    %c0_i32_1 = arith.constant 0 : i32
    return %c0_i32, %c0_i32_0 : i32, i32
  }
  func.func @transform_3(%arg0: i32, %arg1: i32) -> (i32, i32, i32, i32) {
    %c0_i32 = arith.constant 0 : i32
    %c0_i32_0 = arith.constant 0 : i32
    %c0_i32_1 = arith.constant 0 : i32
    return %arg0, %c0_i32, %arg1, %c0_i32_0 : i32, i32, i32, i32
  }
  func.func @transform_4(%arg0: i32, %arg1: i32) -> (i32, i32, i32, i32) {
    %c0_i32 = arith.constant 0 : i32
    %c0_i32_0 = arith.constant 0 : i32
    %c0_i32_1 = arith.constant 0 : i32
    return %arg0, %c0_i32, %arg1, %c0_i32_0 : i32, i32, i32, i32
  }
  func.func @transform_5(%arg0: i32, %arg1: i32) -> (i32, i32, i32, i32) {
    %c0_i32 = arith.constant 0 : i32
    %c0_i32_0 = arith.constant 0 : i32
    %c0_i32_1 = arith.constant 0 : i32
    return %arg0, %c0_i32, %arg1, %c0_i32_0 : i32, i32, i32, i32
  }
}

</mosaic_0001>

<bundles_post_ra>
// kernel: tpu_custom_call.1
= control target key start
LH: loop header
LB: loop body
LE: loop exit
PB: predicated region body
PF: predicated region fallthrough
CT: control target
= control target key end

     0   :  { %s1258_s0 = inlined_call_operand.hbm [shape: f32[2,8,32], index: 0, kind: input, shape index: {}]   ;;  %s1259_s1 = inlined_call_operand.hbm [shape: bf16[32,96], index: 1, kind: input, shape index: {}]   ;;  %s1260_s2 = inlined_call_operand.vmem [shape: f32[1,96], index: 2, kind: input, shape index: {}]   ;;  %s1261_s3 = inlined_call_operand.hbm [shape: bf16[2,4,8,8], index: 3, kind: output, shape index: {0}]   ;;  %s1262_s4 = inlined_call_operand.hbm [shape: bf16[2,4,8,8], index: 4, kind: output, shape index: {1}]   ;;  %s1263_s5 = inlined_call_operand.hbm [shape: bf16[2,4,8,8], index: 5, kind: output, shape index: {2}]  }
   0x1   :  { %1269 = sst [smem:[#allocation15_spill]] %s1258_s0 }
   0x2   :  { %11 = vsyncpa [#allocation3], 0 }
   0x3   :  { %13 = vsyncpa [#allocation3 + $0x1], 0 }
   0x4   :  { %14 = vsyncpa [#allocation6], 0 }
   0x5   :  { %15 = vsyncpa [#allocation4], 0 }
   0x6   :  { %17 = vsyncpa [#allocation4 + $0x1], 0 }
   0x7   :  { %18 = vsyncpa [#allocation9], 0 }
   0x8   :  { %20 = vsyncpa [#allocation9 + $0x1], 0  ;;  %s1017_s18 = smov 0   ;;  %s1019_s19 = smov 0  }
   0x9   :  { %s1021_s20 = smov 0   ;;  %s1023_s21 = smov 0  }
   0xa   :  { %s1025_s22 = smov 0   ;;  %s1027_s23 = smov 0  }
   0xb LB: > { %s1048_s24 = sadd.s32 4294967295, %s970_s23   ;;  %p621_p0 = scmp.ge.s32.totalorder %s970_s23, 1  ;;  %s970_s23 = sphi %s1027_s23, %s26_s23   ;;  %s966_s22 = sphi %s1025_s22, %s1283_s22   ;;  %s962_s21 = sphi %s1023_s21, %s1282_s21   ;;  %s958_s20 = sphi %s1021_s20, %s1281_s20   ;;  %s954_s19 = sphi %s1019_s19, %s1280_s19   ;;  %s950_s18 = sphi %s1017_s18, %s1279_s18  }
   0xc   : > { %p61_p1 = scmp.eq.s32.totalorder %s1048_s24, 0  ;;  %p197_p2 = scmp.lt.s32.totalorder %s970_s23, 3 }
   0xd   : > { %s208_s27 = sshll.u32 %s1259_s1, 4  ;;  %s972_s29 = smov [#allocation5]   ;;  %s209_s27 = int_to_ptr.hbm [resolvable:$true] %s208_s27 }
   0xe   : > { %p1056_p3 = pnand %p621_p0, %p197_p2  ;;  %s210_s30 = sshll.u32 %s972_s29, 4  ;;  %s211_s30 = int_to_ptr.vmem [resolvable:$true] %s210_s30 }
   0xf   : > { %p623_p6 = scmp.ge.s32.totalorder %s970_s23, 2  ;;  %s973_s6 = smov 64  }
  0x10   : > { %p678_p4 = pneg %p1056_p3  ;;  %s974_s7 = smov 4  }
  0x11   : > { %s1264_s8 = sadd.s32 4294967294, %s970_s23   ;;  %s38_s9 = sadd.s32 1, %s966_s22 }
  0x12   : > { %p679_p5 = pnand %p678_p4, %p61_p1  ;;  %s47_s10 = sadd.s32 1, %s958_s20 }
  0x13   : > { %p40_p7 = scmp.ge.s32.totalorder %s38_s9, 2  ;;  %p54_p8 = scmp.ne.s32.totalorder %s958_s20, %s954_s19 }
  0x14   : > { %681 = dma.hbm_to_vmem [thread:$0]  (!%p679_p5), %s209_s27, 256, %s211_s30, [#allocation6], %s973_s6, %s973_s6, %s974_s7  }
  0x15   : > { %p55_p9 = scmp.eq.s32.totalorder %s970_s23, 0  ;;  %p60_p10 = scmp.ne.s32.totalorder %s954_s19, %s950_s18 }
  0x16   : > { %s1285_s9 = smov (%p40_p7, %s38_s9), 0  ;;  %p128_p13 = scmp.eq.s32.totalorder %s1048_s24, 1 }
  0x17   : > { %p1075_p11 = por %p55_p9, %p54_p8  ;;  %p1081_p12 = por %p61_p1, %p60_p10 }
  0x18   : > { %s42_s13 = ssub.s32 %s966_s22, %s1285_s9  ;;  %p134_p2 = scmp.eq.s32.totalorder %s1264_s8, 1 }
  0x19   : > { %p45_p0 = scmp.eq.s32.totalorder %s42_s13, 0  ;;  %p1090_p4 = por %p128_p13, %p54_p8 }
  0x1a   : > { %p697_p5 = scmp.lt.s32.totalorder %s970_s23, 2  ;;  %p1098_p7 = por %p134_p2, %p60_p10 }
  0x1b   : > { %s1096_s15 = scalar_select %p45_p0, %s958_s20, %s47_s10  }
  0x1c   : > { %s227_s17 = sand.u32 1, %s958_s20   ;;  %s625_s26 = sshll.u32 %s966_s22, 3 }
  0x1d   : > { %s624_s25 = sshll.u32 %s227_s17, 3  ;;  %s1275_s0 = sld [smem:[#allocation15_spill]] }
  0x1e   : > { %s231_s6 = scalar_lea.vmem [#allocation2], %s624_s25  ;;  %p683_p8 = pnand %p697_p5, %p1075_p11 }
  0x1f   : > { %s240_s7 = sshll.u32 %s231_s6, 4  ;;  %s228_s10 = scalar_lea.sflag [#allocation3], %s227_s17  ;;  %s241_s7 = int_to_ptr.vmem [resolvable:$true] %s240_s7 }
  0x20   : > { %s1112_s8 = sand.u32 (!%p1056_p3), 1, %s954_s19  }
  0x21   : > { %249 = sbr.rel (%p1056_p3) target bundleno = 334 (0x14e), region = 32  ;;  %s627_s27 = sshll.u32 (!%p1056_p3), %s1112_s8, 3 }
  0x22   : > { %s255_s25 = scalar_lea.vmem (!%p1056_p3), [#allocation2], %s627_s27 }
  0x23   : > { %s236_s30 = scalar_lea.hbm %s1275_s0, %s625_s26  ;;  %s252_s26 = scalar_lea.sflag (!%p1056_p3), [#allocation3], %s1112_s8 }
  0x24   : > { %s238_s13 = sshll.u32 %s236_s30, 4  ;;  %s239_s13 = int_to_ptr.hbm [resolvable:$true] %s238_s13 }
  0x25   : > { %685 = dma.hbm_to_vmem [thread:$0]  (!%p683_p8), %s239_s13, 128, %s241_s7, %s228_s10  }
  0x26   : > { %933 = dma.done.wait (%p1081_p12), %s252_s26, 128  }
  0x27   : > { %935 = vsyncadd (%p1081_p12), %s252_s26, 4294967168 }
  0x28   : > { %937 = dma.done.wait (%p61_p1), [#allocation6], 256  }
  0x29   : > { %939 = vsyncadd (%p61_p1), [#allocation6], 4294967040  ;;  %v662_v0 = vld [vmem:[#allocation5 + $0x8] sm:$0xff]  ;;  %v661_v1 = vld [vmem:[#allocation5] sm:$0xff]  ;;  %vm321_vm0 = vcmask 261120   ;;  %s1128_s12 = sshll.u32 %s1112_s8, 4 }
  0x2a   : > { %331 = vmatpush.bf16.msra.mxu0 %v662_v0  ;;  %v299_v2 = vld [vmem:[%s255_s25] sm:$0xff]  ;;  %vm339_vm1 = vcmask 60416   ;;  %s1265_s17 = smov 64   ;;  %s976_s29 = smov 80  }
  0x2b   : > { %v300_v3 = vpack.c.bf16 %v299_v2, %v299_v2  ;;  %v763_v4 = vld [vmem:[%s1260_s2] ss:$0 sm:$0xff]  ;;  %s1132_s30 = scalar_lea.vmem [#allocation7], %s1128_s12  ;;  %s977_s6 = smov 96  }
  0x2c   : > { %s978_s7 = smov 120   ;;  %s979_s13 = smov 72  }
  0x2d   : > { %s980_s10 = smov 88   ;;  %s981_s27 = smov 48  }
  0x2e   : > { %332 = vmatpush.bf16.msra.mxu0 %v661_v1  ;;  %s982_s26 = smov 112   ;;  %s983_s25 = smov 56  }
  0x2f   : > { %s984_s28 = smov 40   ;;  %s985_s11 = smov 104  }
  0x31   : > { %640 = vmatmul.msk.bf16.vlgmr.msra.gmra.mxu0 %vm321_vm0, %v300_v3 }
  0xae   : > { %v334_v5 = vpop.f32.mrf.mxu0 }
  0xaf   : > { %v335_v6 = vadd.f32 %v763_v4, %v334_v5 }
  0xb1   : > { %v338_v7 = vpack.c.bf16 %v335_v6, %v335_v6 }
  0xb3   : > { %346 = vrot.lane.b32.xlu2 %v338_v7, %s1265_s17  ;;  %370 = vrot.lane.b32.xlu1 %v338_v7, %s976_s29  ;;  %340 = vst.msk [vmem:[%s1132_s30] sm:$0xf] %vm339_vm1, %v338_v7  ;;  %s1137_s29 = scalar_lea.vmem [#allocation10], %s1128_s12 }
  0xb4   : > { %342 = vrot.lane.b32.xlu0 %v338_v7, %s977_s6  ;;  %s1146_s6 = sshll.u32 %s962_s21, 4 }
  0xb6   : > { %v336_v8 = vpop.f32.mrf.mxu0 }
  0xbb   : > { %350 = vrot.lane.b32.xlu2 %v338_v7, %s978_s7  ;;  %385 = vrot.lane.b32.xlu1 %v338_v7, %s979_s13  ;;  %s290_s7 = scalar_lea.vmem [#allocation8], %s1128_s12 }
  0xbc   : > { %355 = vrot.lane.b32.xlu0 %v338_v7, %s980_s10  ;;  %s844_s10 = scalar_lea.hbm %s1262_s4, 32 }
  0xc3   : > { %375 = vrot.lane.b32.xlu2 %v338_v7, %s981_s27  ;;  %365 = vrot.lane.b32.xlu1 %v338_v7, %s982_s26  ;;  %s436_s27 = scalar_lea.hbm %s1262_s4, %s1146_s6  ;;  %s437_s26 = sshll.u32 %s290_s7, 4  ;;  %s438_s26 = int_to_ptr.vmem [resolvable:$true] %s437_s26 }
  0xc4   : > { %360 = vrot.lane.b32.xlu0 %v338_v7, %s983_s25  ;;  %s400_s25 = sand.u32 1, %s1048_s24  }
  0xc5   : > { %s1158_s21 = scalar_lea.sflag [#allocation9], %s400_s25 }
  0xcb   : > { %390 = vrot.lane.b32.xlu1 %v338_v7, %s984_s28  ;;  %s439_s28 = sshll.u32 %s436_s27, 4  ;;  %s440_s28 = int_to_ptr.hbm [resolvable:$true] %s439_s28 }
  0xcc   : > { %380 = vrot.lane.b32.xlu0 %v338_v7, %s985_s11  ;;  %s838_s12 = sshra.s32 %s440_s28, 4  ;;  %s839_s12 = int_to_ptr.hbm [resolvable:$true] %s838_s12 }
  0xcd   : > { %s840_s11 = scalar_lea.hbm %s839_s12, 16  ;;  %p845_p10 = scmp.lt.s32.totalorder %s839_s12, %s1262_s4 }
  0xce   : > { %p841_p1 = scmp.ne.s32.totalorder %s839_s12, %s840_s11  ;;  %p846_p11 = scmp.lt.s32.totalorder %s844_s10, %s840_s11 }
  0xd0   : > { %p842_p3 = pnand %p841_p1, %p1090_p4  ;;  %p847_p12 = por %p846_p11, %p845_p10 }
  0xd2   : > { %p843_p9 = pneg %p842_p3 }
  0xd4   : > { %p848_p13 = pnand %p847_p12, %p843_p9 }
 0x10d   : > { %v347_v9 = vpop.permute.xlu2 %346 }
 0x10e   : > { %349 = vst.msk [vmem:[%s1137_s29] sm:$0xf] %vm339_vm1, %v347_v9 }
 0x115   : > { %v351_v10 = vpop.permute.xlu2 %350 }
 0x116   : > { %641 = vst.msk [vmem:[%s1132_s30 + $0x4] sm:$0xf] %vm339_vm1, %v351_v10 }
 0x11d   : > { %v376_v11 = vpop.permute.xlu2 %375 }
 0x11e   : > { %646 = vst.msk [vmem:[%s1137_s29 + $0x8] sm:$0xf] %vm339_vm1, %v376_v11 }
 0x125   : > { %v371_v12 = vpop.permute.xlu1 %370 }
 0x126   : > { %645 = vst.msk [vmem:[%s290_s7 + $0x8] sm:$0xf] %vm339_vm1, %v371_v12  ;;  %v343_v13 = vpop.permute.xlu0 %342 }
 0x127   : > { %345 = vst.msk [vmem:[%s290_s7] sm:$0xf] %vm339_vm1, %v343_v13 }
 0x12d   : > { %v386_v14 = vpop.permute.xlu1 %385 }
 0x12e   : > { %648 = vst.msk [vmem:[%s290_s7 + $0xc] sm:$0xf] %vm339_vm1, %v386_v14  ;;  %v356_v15 = vpop.permute.xlu0 %355 }
 0x12f   : > { %642 = vst.msk [vmem:[%s290_s7 + $0x4] sm:$0xf] %vm339_vm1, %v356_v15 }
 0x130   : > { %851 = shalt.err (!%p848_p13)
}
 0x131   : > { %s1267_s7 = smov 4   ;;  %s1276_s25 = smov 64  }
 0x132   : > { %673 = dma.vmem_to_hbm [thread:$0]  (%p1090_p4), %s438_s26, 256, %s440_s28, %s1158_s21, %s1276_s25, %s1276_s25, %s1267_s7  }
 0x133   : > { %s418_s11 = scalar_lea.hbm %s1261_s3, %s1146_s6  ;;  %s454_s10 = scalar_lea.hbm %s1263_s5, %s1146_s6 }
 0x134   : > { %s419_s27 = sshll.u32 %s1132_s30, 4  ;;  %s1187_s0 = sshll.u32 %s418_s11, 4  ;;  %s420_s27 = int_to_ptr.vmem [resolvable:$true] %s419_s27  ;;  %s422_s0 = int_to_ptr.hbm [resolvable:$true] %s1187_s0 }
 0x135   : > { %v366_v16 = vpop.permute.xlu1 %365  ;;  %s455_s26 = sshll.u32 %s1137_s29, 4  ;;  %s1190_s28 = sshll.u32 %s454_s10, 4  ;;  %s1193_s26 = int_to_ptr.vmem [resolvable:$true] %s455_s26  ;;  %s458_s28 = int_to_ptr.hbm [resolvable:$true] %s1190_s28 }
 0x136   : > { %644 = vst.msk [vmem:[%s1132_s30 + $0x8] sm:$0xf] %vm339_vm1, %v366_v16  ;;  %v361_v17 = vpop.permute.xlu0 %360  ;;  %s396_s6 = scalar_lea.sflag [#allocation4], %s1112_s8  ;;  %s866_s17 = sshra.s32 %s422_s0, 4  ;;  %s867_s17 = int_to_ptr.hbm [resolvable:$true] %s866_s17 }
 0x137   : > { %643 = vst.msk [vmem:[%s1137_s29 + $0x4] sm:$0xf] %vm339_vm1, %v361_v17  ;;  %s868_s12 = scalar_lea.hbm %s867_s17, 16  ;;  %s872_s24 = scalar_lea.hbm %s1261_s3, 32 }
 0x138   : > { %p869_p0 = scmp.ne.s32.totalorder %s867_s17, %s868_s12  ;;  %p873_p8 = scmp.lt.s32.totalorder %s867_s17, %s1261_s3 }
 0x139   : > { %p874_p1 = scmp.lt.s32.totalorder %s872_s24, %s868_s12 }
 0x13a   : > { %p870_p2 = pnand %p869_p0, %p1090_p4 }
 0x13b   : > { %p875_p3 = por %p874_p1, %p873_p8 }
 0x13c   : > { %p871_p5 = pneg %p870_p2 }
 0x13d   : > { %v391_v18 = vpop.permute.xlu1 %390 }
 0x13e   : > { %649 = vst.msk [vmem:[%s1137_s29 + $0xc] sm:$0xf] %vm339_vm1, %v391_v18  ;;  %v381_v19 = vpop.permute.xlu0 %380  ;;  %p876_p9 = pnand %p875_p3, %p871_p5 }
 0x13f   : > { %647 = vst.msk [vmem:[%s1132_s30 + $0xc] sm:$0xf] %vm339_vm1, %v381_v19 }
 0x140   : > { %879 = shalt.err (!%p876_p9)
}
 0x141   : > { %s1277_s8 = smov 4   ;;  %s894_s30 = sshra.s32 %s458_s28, 4  ;;  %s895_s30 = int_to_ptr.hbm [resolvable:$true] %s894_s30 }
 0x142   : > { %672 = dma.vmem_to_hbm [thread:$0]  (%p1090_p4), %s420_s27, 256, %s422_s0, %s396_s6, %s1276_s25, %s1276_s25, %s1277_s8  }
 0x143   : > { %s896_s29 = scalar_lea.hbm %s895_s30, 16  ;;  %s900_s12 = scalar_lea.hbm %s1263_s5, 32 }
 0x144   : > { %p897_p10 = scmp.ne.s32.totalorder %s895_s30, %s896_s29  ;;  %p901_p13 = scmp.lt.s32.totalorder %s895_s30, %s1263_s5 }
 0x145   : > { %p902_p0 = scmp.lt.s32.totalorder %s900_s12, %s896_s29 }
 0x146   : > { %p898_p11 = pnand %p897_p10, %p1090_p4 }
 0x147   : > { %p903_p2 = por %p902_p0, %p901_p13 }
 0x148   : > { %p899_p12 = pneg %p898_p11 }
 0x14a   : > { %p904_p5 = pnand %p903_p2, %p899_p12 }
 0x14c   : > { %907 = shalt.err (!%p904_p5)
}
 0x14d   : > { %674 = dma.vmem_to_hbm [thread:$0]  (%p1090_p4), %s1193_s26, 256, %s458_s28, %s1158_s21, %s1276_s25, %s1276_s25, %s1277_s8  }
 0x14e PF: > { %s472_s0 = sand.u32 1, %s950_s18   ;;  %p687_p8 = pnand %p623_p6, %p1098_p7 }
 0x14f   : > { %s473_s27 = scalar_lea.sflag [#allocation4], %s472_s0 }
 0x150   : > { %p688_p1 = pneg %p687_p8 }
 0x152   : > { %941 = dma.done.wait (%p688_p1), %s473_s27, 256  }
 0x153   : > { %943 = vsyncadd (%p688_p1), %s473_s27, 4294967040  ;;  %s1278_s14 = sadd.s32 4294967294, %s970_s23  }
 0x154   : > { %s482_s6 = sand.u32 1, %s1278_s14  }
 0x155   : > { %s483_s24 = scalar_lea.sflag [#allocation9], %s482_s6 }
 0x156   : > { %945 = dma.done.wait (%p688_p1), %s483_s24, 512  }
 0x157   : > { %947 = vsyncadd (%p688_p1), %s483_s24, 4294966784  ;;  %s26_s23 = sadd.s32 1, %s970_s23   ;;  %s1279_s18 = smov %s954_s19 }
 0x158   : > { %p23_p4 = scmp.ge.s32.totalorder %s26_s23, 4   ;;  %s1280_s19 = smov %s958_s20 }
 0x159   : > { %s1281_s20 = smov %s1096_s15  ;;  %s1282_s21 = smov %s966_s22 }
 0x15a   : > { %s1283_s22 = smov %s1285_s9  ;;  %25 = sbr.rel (!%p23_p4) target bundleno = 11 (0xb), region = 122 }
 0x15f   :  { %499 = vsyncpa [#allocation3], 1 }
 0x160   :  { %501 = vsyncpa [#allocation3 + $0x1], 1 }
 0x161   :  { %502 = vsyncpa [#allocation6], 1 }
 0x162   :  { %503 = vsyncpa [#allocation4], 1 }
 0x163   :  { %505 = vsyncpa [#allocation4 + $0x1], 1 }
 0x164   :  { %506 = vsyncpa [#allocation9], 1 }
 0x165   :  { %508 = vsyncpa [#allocation9 + $0x1], 1 }

</bundles_post_ra>
